<compile_context>
chip_gen: v5e
topology: v5e:2x2
jax: 0.10.0
libtpu: 0.0.40
codegen_flags: <defaults>
</compile_context>

<pallas_src>
import functools

import jax
import jax.numpy as jnp
from jax.experimental import pallas as pl
from jax.experimental.pallas import tpu as pltpu

_LANE = 128  # vreg lane width: hidden feature dims are padded to this


def _round_up(x, m):
    return (x + m - 1) // m * m


def _sublane(dtype):
    """Sublane quantum for a dtype: 8 rows (f32), 16 (bf16), 32 (int8/fp8)."""
    return max(8, 32 // jnp.dtype(dtype).itemsize)


def _vmem_tile_bytes(shape, dtype):
    """VMEM footprint of a 2-D block after (sublane, lane) layout padding."""
    rows = _round_up(shape[0], _sublane(dtype))
    cols = _round_up(shape[1], _LANE)
    return rows * cols * jnp.dtype(dtype).itemsize


def _relu(x):
    return jnp.maximum(x, 0.0)


def _mlp_kernel(n_layers, activation, *refs):
    """Fused MLP over one batch tile.

    refs layout: (z_ref, w_0..w_{n-1}, b_0..b_{n-1}, out_ref).
    Hidden layers: Linear + activation; final layer: Linear only (matches the
    nn.Sequential in the PyTorch Decoder).
    """
    z_ref = refs[0]
    w_refs = refs[1:1 + n_layers]
    b_refs = refs[1 + n_layers:1 + 2 * n_layers]
    o_ref = refs[1 + 2 * n_layers]

    h = z_ref[...]
    for i in range(n_layers):
        w = w_refs[i][...]
        # Feed the MXU in the weights' native (possibly bf16) dtype; accumulate f32.
        lhs = h if h.dtype == w.dtype else h.astype(w.dtype)
        acc = jnp.dot(lhs, w, preferred_element_type=jnp.float32)
        acc = acc + b_refs[i][...].astype(jnp.float32)
        if i < n_layers - 1:
            acc = activation(acc)
        h = acc
    o_ref[...] = h.astype(o_ref.dtype)


def pad_decoder_params(weights, biases):
    """One-time zero-padding of the HIDDEN feature dims to 128 lanes.

    The first layer's fan_in and the last layer's fan_out keep their true
    widths, so the kernel's input/output DMAs carry no padding bytes.  Call
    once at init and reuse (keeps the per-call hot path free of pad ops).
    """
    n = len(weights)
    dims = [weights[0].shape[0]] + [w.shape[1] for w in weights]
    pdims = list(dims)
    for i in range(1, n):  # hidden dims only
        # TODO(synk): if hidden dims ever exceed 128 and the matmuls become
        # MXU-bound, pad to 256 on v6e/v7x to fill the 2x256x256 MXU.
        pdims[i] = _round_up(dims[i], _LANE)

    w_pad, b_pad = [], []
    for i, (w, b) in enumerate(zip(weights, biases)):
        wp = jnp.zeros((pdims[i], pdims[i + 1]), w.dtype)
        wp = wp.at[: w.shape[0], : w.shape[1]].set(w)
        bp = jnp.zeros((1, pdims[i + 1]), b.dtype)
        bp = bp.at[:, : b.shape[-1]].set(b.reshape(1, -1))
        w_pad.append(wp)
        b_pad.append(bp)
    return w_pad, b_pad


def decoder_forward(z, padded_weights, padded_biases, *, activation=_relu,
                    block_b=None):
    """Run the fused Decoder MLP as a single pallas_call.

    Args:
      z:               [B, in_dims] latents (feature dim NOT padded).
      padded_weights:  output of pad_decoder_params (list of [fan_in, fan_out]).
      padded_biases:   output of pad_decoder_params (list of [1, fan_out]).
      activation:      elementwise activation applied after every hidden layer.
      block_b:         optional batch tile override (rounded to the sublane quantum).
    Returns:
      [B, out_dim] with out_dim = padded_weights[-1].shape[1] (unpadded).
    """
    n_layers = len(padded_weights)
    B, in_dims = z.shape
    assert padded_weights[0].shape[0] == in_dims
    out_dim = padded_weights[-1].shape[1]
    out_dtype = z.dtype

    # ---- batch tile selection (dtype-aware sublane quantum).
    q = _sublane(z.dtype)
    if block_b is None:
        block_b = 512  # large tiles amortize the ~0.35us/step cost on v5e/v6e
        if pl.cdiv(B, min(block_b, _round_up(B, q))) < 2 and B > q:
            # Keep >= 2 grid steps so both v7x TensorCores get work.
            block_b = pl.cdiv(B, 2)
    block_b = max(q, _round_up(min(block_b, _round_up(B, q)), q))
    n_tiles = pl.cdiv(B, block_b)  # ragged batch: last tile is masked by Pallas

    def _make_call(use_buffered):
        # Grid-invariant params: single-buffered when supported.
        param_kwargs = {}
        if use_buffered and hasattr(pl, "Buffered"):
            param_kwargs = dict(pipeline_mode=pl.Buffered(1))

        in_specs = [pl.BlockSpec((block_b, in_dims), lambda i: (i, 0))]
        in_specs += [pl.BlockSpec(w.shape, lambda i: (0, 0), **param_kwargs)
                     for w in padded_weights]
        in_specs += [pl.BlockSpec(b.shape, lambda i: (0, 0), **param_kwargs)
                     for b in padded_biases]
        out_spec = pl.BlockSpec((block_b, out_dim), lambda i: (i, 0))

        # ---- honest VMEM budget with headroom (v7x: 64 MiB physical per TC).
        pbuf = 1 if param_kwargs else 2
        est = 2 * _vmem_tile_bytes((block_b, in_dims), z.dtype)      # z (double-buffered)
        est += 2 * _vmem_tile_bytes((block_b, out_dim), out_dtype)   # out (double-buffered)
        est += sum(pbuf * _vmem_tile_bytes(w.shape, w.dtype) for w in padded_weights)
        est += sum(pbuf * _vmem_tile_bytes(b.shape, b.dtype) for b in padded_biases)
        max_feat = max([in_dims, out_dim] + [w.shape[1] for w in padded_weights])
        est += 2 * _vmem_tile_bytes((block_b, max_feat), jnp.float32)  # live f32 acts
        vmem_limit = int(min(max(est + est // 2, 16 * 1024 * 1024),
                             48 * 1024 * 1024))

        return pl.pallas_call(
            functools.partial(_mlp_kernel, n_layers, activation),
            out_shape=jax.ShapeDtypeStruct((B, out_dim), out_dtype),
            grid_spec=pltpu.PrefetchScalarGridSpec(
                num_scalar_prefetch=0,
                grid=(n_tiles,),
                in_specs=in_specs,
                out_specs=out_spec,
            ),
            compiler_params=pltpu.CompilerParams(
                dimension_semantics=("parallel",),
                vmem_limit_bytes=vmem_limit,
            ),
        )

    try:
        return _make_call(True)(z, *padded_weights, *padded_biases)
    except Exception:
        # Fallback if pipeline_mode=pl.Buffered(1) is rejected by this Pallas build.
        return _make_call(False)(z, *padded_weights, *padded_biases)


def init_decoder_params(key, in_dims, hidden_dims, out_dim, dtype=jnp.float32):
    """Deterministic synthetic parameter init (same shapes as the nn.Module)."""
    dims = [in_dims] + list(hidden_dims) + [out_dim]
    weights, biases = [], []
    for li in range(len(dims) - 1):
        key, wk, bk = jax.random.split(key, 3)
        fan_in, fan_out = dims[li], dims[li + 1]
        scale = 1.0 / jnp.sqrt(jnp.asarray(fan_in, jnp.float32))
        # stored as [fan_in, fan_out]  (PyTorch stores [fan_out, fan_in])
        w = jax.random.uniform(wk, (fan_in, fan_out), dtype, -scale, scale)
        b = jax.random.uniform(bk, (1, fan_out), dtype, -scale, scale)
        weights.append(w)
        biases.append(b)
    return weights, biases


def decoder_reference(z, weights, biases):
    """Pure-JAX reference of the PyTorch forward (for correctness checking)."""
    h = z
    n = len(weights)
    for i in range(n):
        h = h @ weights[i] + biases[i]
        if i < n - 1:
            h = jnp.maximum(h, 0.0)
    return h


if __name__ == "__main__":
    # Decoder.from_hparams-style shapes: emb_dim=8, hidden_dims=[32, 64],
    # data_dims=24, activation=ReLU.  Batch 300 exercises the ragged-batch
    # masked edge tile and the >=2-step parallel grid (v7x megacore split).
    batch, in_dims = 300, 8
    hidden_dims = [32, 64]
    out_dim = 24

    key = jax.random.PRNGKey(0)
    key, zk = jax.random.split(key)
    z = jax.random.normal(zk, (batch, in_dims), jnp.float32)

    weights, biases = init_decoder_params(key, in_dims, hidden_dims, out_dim)
    # One-time (cacheable) padding of the hidden feature dims — NOT in the hot path.
    w_pad, b_pad = pad_decoder_params(weights, biases)

    out = decoder_forward(z, w_pad, b_pad)
    out = jax.block_until_ready(out)

    ref = decoder_reference(z, weights, biases)
    assert out.shape == (batch, out_dim), out.shape
    max_err = float(jnp.max(jnp.abs(out - ref)))
    assert jnp.allclose(out, ref, atol=1e-4, rtol=1e-4), f"mismatch, max_err={max_err}"

    print("KERNEL_OK")
</pallas_src>

<mosaic_0001>
module attributes {stable_mosaic.version = 11 : i64} {
  func.func @_mlp_kernel(%arg0: i32, %arg1: memref<152x8xf32, #tpu.memory_space<vmem>>, %arg2: memref<8x128xf32, #tpu.memory_space<vmem>>, %arg3: memref<128x128xf32, #tpu.memory_space<vmem>>, %arg4: memref<128x24xf32, #tpu.memory_space<vmem>>, %arg5: memref<1x128xf32, #tpu.memory_space<vmem>>, %arg6: memref<1x128xf32, #tpu.memory_space<vmem>>, %arg7: memref<1x24xf32, #tpu.memory_space<vmem>>, %arg8: memref<152x24xf32, #tpu.memory_space<vmem>>) attributes {dimension_semantics = [#tpu.dimension_semantics<parallel>], iteration_bounds = array<i64: 2>, scalar_prefetch = 0 : i64, scratch_operands = 0 : i64, tpu.core_type = #tpu.core_type<tc>, window_params = [{transform_indices = @transform_0, window_bounds = array<i64: 152, 8>}, {pipeline_mode = #tpu.pipeline_mode<synchronous>, transform_indices = @transform_1, window_bounds = array<i64: 8, 128>}, {pipeline_mode = #tpu.pipeline_mode<synchronous>, transform_indices = @transform_2, window_bounds = array<i64: 128, 128>}, {pipeline_mode = #tpu.pipeline_mode<synchronous>, transform_indices = @transform_3, window_bounds = array<i64: 128, 24>}, {pipeline_mode = #tpu.pipeline_mode<synchronous>, transform_indices = @transform_4, window_bounds = array<i64: 1, 128>}, {pipeline_mode = #tpu.pipeline_mode<synchronous>, transform_indices = @transform_5, window_bounds = array<i64: 1, 128>}, {pipeline_mode = #tpu.pipeline_mode<synchronous>, transform_indices = @transform_6, window_bounds = array<i64: 1, 24>}, {transform_indices = @transform_7, window_bounds = array<i64: 152, 24>}]} {
    %c0 = arith.constant 0 : index
    %c0_0 = arith.constant 0 : index
    %0 = vector.load %arg1[%c0, %c0_0] : memref<152x8xf32, #tpu.memory_space<vmem>>, vector<152x8xf32>
    %c0_1 = arith.constant 0 : index
    %c0_2 = arith.constant 0 : index
    %1 = vector.load %arg2[%c0_1, %c0_2] : memref<8x128xf32, #tpu.memory_space<vmem>>, vector<8x128xf32>
    %cst = arith.constant dense<0.000000e+00> : vector<152x128xf32>
    %2 = tpu.matmul %0, %1, %cst {dimension_numbers = #tpu.dot_dimension_numbers<[1], [0], [0], [1], [0, 0, 1, 1], [], []>} : vector<152x8xf32>, vector<8x128xf32>, vector<152x128xf32> -> vector<152x128xf32>
    %c0_3 = arith.constant 0 : index
    %c0_4 = arith.constant 0 : index
    %3 = vector.load %arg5[%c0_3, %c0_4] : memref<1x128xf32, #tpu.memory_space<vmem>>, vector<1x128xf32>
    %4 = vector.broadcast %3 : vector<1x128xf32> to vector<152x128xf32>
    %5 = arith.addf %2, %4 : vector<152x128xf32>
    %cst_5 = arith.constant 0.000000e+00 : f32
    %6 = vector.broadcast %cst_5 : f32 to vector<152x128xf32>
    %7 = arith.maximumf %5, %6 : vector<152x128xf32>
    %c0_6 = arith.constant 0 : index
    %c0_7 = arith.constant 0 : index
    %8 = vector.load %arg3[%c0_6, %c0_7] : memref<128x128xf32, #tpu.memory_space<vmem>>, vector<128x128xf32>
    %cst_8 = arith.constant dense<0.000000e+00> : vector<152x128xf32>
    %9 = tpu.matmul %7, %8, %cst_8 {dimension_numbers = #tpu.dot_dimension_numbers<[1], [0], [0], [1], [0, 0, 1, 1], [], []>} : vector<152x128xf32>, vector<128x128xf32>, vector<152x128xf32> -> vector<152x128xf32>
    %c0_9 = arith.constant 0 : index
    %c0_10 = arith.constant 0 : index
    %10 = vector.load %arg6[%c0_9, %c0_10] : memref<1x128xf32, #tpu.memory_space<vmem>>, vector<1x128xf32>
    %11 = vector.broadcast %10 : vector<1x128xf32> to vector<152x128xf32>
    %12 = arith.addf %9, %11 : vector<152x128xf32>
    %cst_11 = arith.constant 0.000000e+00 : f32
    %13 = vector.broadcast %cst_11 : f32 to vector<152x128xf32>
    %14 = arith.maximumf %12, %13 : vector<152x128xf32>
    %c0_12 = arith.constant 0 : index
    %c0_13 = arith.constant 0 : index
    %15 = vector.load %arg4[%c0_12, %c0_13] : memref<128x24xf32, #tpu.memory_space<vmem>>, vector<128x24xf32>
    %cst_14 = arith.constant dense<0.000000e+00> : vector<152x24xf32>
    %16 = tpu.matmul %14, %15, %cst_14 {dimension_numbers = #tpu.dot_dimension_numbers<[1], [0], [0], [1], [0, 0, 1, 1], [], []>} : vector<152x128xf32>, vector<128x24xf32>, vector<152x24xf32> -> vector<152x24xf32>
    %c0_15 = arith.constant 0 : index
    %c0_16 = arith.constant 0 : index
    %17 = vector.load %arg7[%c0_15, %c0_16] : memref<1x24xf32, #tpu.memory_space<vmem>>, vector<1x24xf32>
    %18 = vector.broadcast %17 : vector<1x24xf32> to vector<152x24xf32>
    %19 = arith.addf %16, %18 : vector<152x24xf32>
    %c0_17 = arith.constant 0 : index
    %c0_18 = arith.constant 0 : index
    %20 = vector.load %arg8[%c0_17, %c0_18] : memref<152x24xf32, #tpu.memory_space<vmem>>, vector<152x24xf32>
    tpu.vector_store %arg8[%c0_17, %c0_18], %19 {strides = array<i32>} : memref<152x24xf32, #tpu.memory_space<vmem>>, vector<152x24xf32>,
    return
  }
  func.func @transform_0(%arg0: i32) -> (i32, i32) {
    %c0_i32 = arith.constant 0 : i32
    %c0_i32_0 = arith.constant 0 : i32
    return %arg0, %c0_i32 : i32, i32
  }
  func.func @transform_1(%arg0: i32) -> (i32, i32) {
    %c0_i32 = arith.constant 0 : i32
    %c0_i32_0 = arith.constant 0 : i32
    %c0_i32_1 = arith.constant 0 : i32
    return %c0_i32, %c0_i32_0 : i32, i32
  }
  func.func @transform_2(%arg0: i32) -> (i32, i32) {
    %c0_i32 = arith.constant 0 : i32
    %c0_i32_0 = arith.constant 0 : i32
    %c0_i32_1 = arith.constant 0 : i32
    return %c0_i32, %c0_i32_0 : i32, i32
  }
  func.func @transform_3(%arg0: i32) -> (i32, i32) {
    %c0_i32 = arith.constant 0 : i32
    %c0_i32_0 = arith.constant 0 : i32
    %c0_i32_1 = arith.constant 0 : i32
    return %c0_i32, %c0_i32_0 : i32, i32
  }
  func.func @transform_4(%arg0: i32) -> (i32, i32) {
    %c0_i32 = arith.constant 0 : i32
    %c0_i32_0 = arith.constant 0 : i32
    %c0_i32_1 = arith.constant 0 : i32
    return %c0_i32, %c0_i32_0 : i32, i32
  }
  func.func @transform_5(%arg0: i32) -> (i32, i32) {
    %c0_i32 = arith.constant 0 : i32
    %c0_i32_0 = arith.constant 0 : i32
    %c0_i32_1 = arith.constant 0 : i32
    return %c0_i32, %c0_i32_0 : i32, i32
  }
  func.func @transform_6(%arg0: i32) -> (i32, i32) {
    %c0_i32 = arith.constant 0 : i32
    %c0_i32_0 = arith.constant 0 : i32
    %c0_i32_1 = arith.constant 0 : i32
    return %c0_i32, %c0_i32_0 : i32, i32
  }
  func.func @transform_7(%arg0: i32) -> (i32, i32) {
    %c0_i32 = arith.constant 0 : i32
    %c0_i32_0 = arith.constant 0 : i32
    return %arg0, %c0_i32 : i32, i32
  }
}

module attributes {stable_mosaic.version = 11 : i64} {
  func.func @_mlp_kernel(%arg0: i32, %arg1: memref<152x8xf32, #tpu.memory_space<vmem>>, %arg2: memref<8x128xf32, #tpu.memory_space<vmem>>, %arg3: memref<128x128xf32, #tpu.memory_space<vmem>>, %arg4: memref<128x24xf32, #tpu.memory_space<vmem>>, %arg5: memref<1x128xf32, #tpu.memory_space<vmem>>, %arg6: memref<1x128xf32, #tpu.memory_space<vmem>>, %arg7: memref<1x24xf32, #tpu.memory_space<vmem>>, %arg8: memref<152x24xf32, #tpu.memory_space<vmem>>) attributes {dimension_semantics = [#tpu.dimension_semantics<parallel>], iteration_bounds = array<i64: 2>, scalar_prefetch = 0 : i64, scratch_operands = 0 : i64, tpu.core_type = #tpu.core_type<tc>, window_params = [{transform_indices = @transform_0, window_bounds = array<i64: 152, 8>}, {pipeline_mode = #tpu.pipeline_mode<synchronous>, transform_indices = @transform_1, window_bounds = array<i64: 8, 128>}, {pipeline_mode = #tpu.pipeline_mode<synchronous>, transform_indices = @transform_2, window_bounds = array<i64: 128, 128>}, {pipeline_mode = #tpu.pipeline_mode<synchronous>, transform_indices = @transform_3, window_bounds = array<i64: 128, 24>}, {pipeline_mode = #tpu.pipeline_mode<synchronous>, transform_indices = @transform_4, window_bounds = array<i64: 1, 128>}, {pipeline_mode = #tpu.pipeline_mode<synchronous>, transform_indices = @transform_5, window_bounds = array<i64: 1, 128>}, {pipeline_mode = #tpu.pipeline_mode<synchronous>, transform_indices = @transform_6, window_bounds = array<i64: 1, 24>}, {transform_indices = @transform_7, window_bounds = array<i64: 152, 24>}]} {
    %c0 = arith.constant 0 : index
    %c0_0 = arith.constant 0 : index
    %0 = vector.load %arg1[%c0, %c0_0] : memref<152x8xf32, #tpu.memory_space<vmem>>, vector<152x8xf32>
    %c0_1 = arith.constant 0 : index
    %c0_2 = arith.constant 0 : index
    %1 = vector.load %arg2[%c0_1, %c0_2] : memref<8x128xf32, #tpu.memory_space<vmem>>, vector<8x128xf32>
    %cst = arith.constant dense<0.000000e+00> : vector<152x128xf32>
    %2 = tpu.matmul %0, %1, %cst {dimension_numbers = #tpu.dot_dimension_numbers<[1], [0], [0], [1], [0, 0, 1, 1], [], []>} : vector<152x8xf32>, vector<8x128xf32>, vector<152x128xf32> -> vector<152x128xf32>
    %c0_3 = arith.constant 0 : index
    %c0_4 = arith.constant 0 : index
    %3 = vector.load %arg5[%c0_3, %c0_4] : memref<1x128xf32, #tpu.memory_space<vmem>>, vector<1x128xf32>
    %4 = vector.broadcast %3 : vector<1x128xf32> to vector<152x128xf32>
    %5 = arith.addf %2, %4 : vector<152x128xf32>
    %cst_5 = arith.constant 0.000000e+00 : f32
    %6 = vector.broadcast %cst_5 : f32 to vector<152x128xf32>
    %7 = arith.maximumf %5, %6 : vector<152x128xf32>
    %c0_6 = arith.constant 0 : index
    %c0_7 = arith.constant 0 : index
    %8 = vector.load %arg3[%c0_6, %c0_7] : memref<128x128xf32, #tpu.memory_space<vmem>>, vector<128x128xf32>
    %cst_8 = arith.constant dense<0.000000e+00> : vector<152x128xf32>
    %9 = tpu.matmul %7, %8, %cst_8 {dimension_numbers = #tpu.dot_dimension_numbers<[1], [0], [0], [1], [0, 0, 1, 1], [], []>} : vector<152x128xf32>, vector<128x128xf32>, vector<152x128xf32> -> vector<152x128xf32>
    %c0_9 = arith.constant 0 : index
    %c0_10 = arith.constant 0 : index
    %10 = vector.load %arg6[%c0_9, %c0_10] : memref<1x128xf32, #tpu.memory_space<vmem>>, vector<1x128xf32>
    %11 = vector.broadcast %10 : vector<1x128xf32> to vector<152x128xf32>
    %12 = arith.addf %9, %11 : vector<152x128xf32>
    %cst_11 = arith.constant 0.000000e+00 : f32
    %13 = vector.broadcast %cst_11 : f32 to vector<152x128xf32>
    %14 = arith.maximumf %12, %13 : vector<152x128xf32>
    %c0_12 = arith.constant 0 : index
    %c0_13 = arith.constant 0 : index
    %15 = vector.load %arg4[%c0_12, %c0_13] : memref<128x24xf32, #tpu.memory_space<vmem>>, vector<128x24xf32>
    %cst_14 = arith.constant dense<0.000000e+00> : vector<152x24xf32>
    %16 = tpu.matmul %14, %15, %cst_14 {dimension_numbers = #tpu.dot_dimension_numbers<[1], [0], [0], [1], [0, 0, 1, 1], [], []>} : vector<152x128xf32>, vector<128x24xf32>, vector<152x24xf32> -> vector<152x24xf32>
    %c0_15 = arith.constant 0 : index
    %c0_16 = arith.constant 0 : index
    %17 = vector.load %arg7[%c0_15, %c0_16] : memref<1x24xf32, #tpu.memory_space<vmem>>, vector<1x24xf32>
    %18 = vector.broadcast %17 : vector<1x24xf32> to vector<152x24xf32>
    %19 = arith.addf %16, %18 : vector<152x24xf32>
    %c0_17 = arith.constant 0 : index
    %c0_18 = arith.constant 0 : index
    %20 = vector.load %arg8[%c0_17, %c0_18] : memref<152x24xf32, #tpu.memory_space<vmem>>, vector<152x24xf32>
    tpu.vector_store %arg8[%c0_17, %c0_18], %19 {strides = array<i32>} : memref<152x24xf32, #tpu.memory_space<vmem>>, vector<152x24xf32>,
    return
  }
  func.func @transform_0(%arg0: i32) -> (i32, i32) {
    %c0_i32 = arith.constant 0 : i32
    %c0_i32_0 = arith.constant 0 : i32
    return %arg0, %c0_i32 : i32, i32
  }
  func.func @transform_1(%arg0: i32) -> (i32, i32) {
    %c0_i32 = arith.constant 0 : i32
    %c0_i32_0 = arith.constant 0 : i32
    %c0_i32_1 = arith.constant 0 : i32
    return %c0_i32, %c0_i32_0 : i32, i32
  }
  func.func @transform_2(%arg0: i32) -> (i32, i32) {
    %c0_i32 = arith.constant 0 : i32
    %c0_i32_0 = arith.constant 0 : i32
    %c0_i32_1 = arith.constant 0 : i32
    return %c0_i32, %c0_i32_0 : i32, i32
  }
  func.func @transform_3(%arg0: i32) -> (i32, i32) {
    %c0_i32 = arith.constant 0 : i32
    %c0_i32_0 = arith.constant 0 : i32
    %c0_i32_1 = arith.constant 0 : i32
    return %c0_i32, %c0_i32_0 : i32, i32
  }
  func.func @transform_4(%arg0: i32) -> (i32, i32) {
    %c0_i32 = arith.constant 0 : i32
    %c0_i32_0 = arith.constant 0 : i32
    %c0_i32_1 = arith.constant 0 : i32
    return %c0_i32, %c0_i32_0 : i32, i32
  }
  func.func @transform_5(%arg0: i32) -> (i32, i32) {
    %c0_i32 = arith.constant 0 : i32
    %c0_i32_0 = arith.constant 0 : i32
    %c0_i32_1 = arith.constant 0 : i32
    return %c0_i32, %c0_i32_0 : i32, i32
  }
  func.func @transform_6(%arg0: i32) -> (i32, i32) {
    %c0_i32 = arith.constant 0 : i32
    %c0_i32_0 = arith.constant 0 : i32
    %c0_i32_1 = arith.constant 0 : i32
    return %c0_i32, %c0_i32_0 : i32, i32
  }
  func.func @transform_7(%arg0: i32) -> (i32, i32) {
    %c0_i32 = arith.constant 0 : i32
    %c0_i32_0 = arith.constant 0 : i32
    return %arg0, %c0_i32 : i32, i32
  }
}

</mosaic_0001>

<bundles_post_ra>
// kernel: tpu_custom_call.1
= control target key start
LH: loop header
LB: loop body
LE: loop exit
PB: predicated region body
PF: predicated region fallthrough
CT: control target
= control target key end

     0   :  { %s859_s24 = smov 0   ;;  %s1134_s0 = inlined_call_operand.vmem [shape: f32[300,8], index: 0, kind: input, shape index: {}]   ;;  %s1135_s1 = inlined_call_operand.vmem [shape: f32[8,128], index: 1, kind: input, shape index: {}]   ;;  %s1136_s2 = inlined_call_operand.vmem [shape: f32[128,128], index: 2, kind: input, shape index: {}]   ;;  %s1137_s3 = inlined_call_operand.vmem [shape: f32[128,24], index: 3, kind: input, shape index: {}]   ;;  %s1138_s4 = inlined_call_operand.vmem [shape: f32[1,128], index: 4, kind: input, shape index: {}]   ;;  %s1139_s5 = inlined_call_operand.vmem [shape: f32[1,128], index: 5, kind: input, shape index: {}]   ;;  %s1140_s6 = inlined_call_operand.vmem [shape: f32[1,24], index: 6, kind: input, shape index: {}]   ;;  %s1141_s7 = inlined_call_operand.vmem [shape: f32[300,24], index: 7, kind: output, shape index: {}]  }
   0x1 LB: > { %s740_s25 = sadd.s32 4294967295, %s817_s24   ;;  %p744_p0 = scmp.ge.s32.totalorder %s817_s24, 1  ;;  %s817_s24 = sphi %s859_s24, %s17_s24  }
   0x2   : > { %p238_p1 = scmp.lt.s32.totalorder %s817_s24, 3 }
   0x4   : > { %p239_p2 = pnand %p744_p0, %p238_p1 }
   0x5   : > { %s270_s28 = smul.u32 (!%p239_p2), 19, %s740_s25 }
   0x6   : > { %242 = sbr.rel (%p239_p2) target bundleno = 560 (0x230), region = 48 }
   0x7   : > { %p271_p3 = scmp.lt.s32.totalorder (!%p239_p2), %s270_s28, 37 }
   0xb   : > { %v301_v0 = vld [vmem:[%s1135_s1] sm:$0xff]  ;;  %s1143_s28 = smov (!%p271_p3, %s270_s28), 37  ;;  %vm306_vm0 = vcmask 64512   ;;  %v472_v10 = vld [vmem:[%s1136_s2 + $0x78] sm:$0xff]  ;;  %v471_v11 = vld [vmem:[%s1136_s2 + $0x70] sm:$0xff]  ;;  %vm664_vm1 = vcmask 195584  }
   0xc   : > { %379 = vmatpush.msra.mxu0 %v301_v0  ;;  %s745_s29 = sshll.u32 %s1143_s28, 3  ;;  %477 = vmatpush.msra.mxu1 %v472_v10  ;;  %v470_v12 = vld [vmem:[%s1136_s2 + $0x68] sm:$0xff]  ;;  %v469_v14 = vld [vmem:[%s1136_s2 + $0x60] sm:$0xff]  ;;  %v468_v15 = vld [vmem:[%s1136_s2 + $0x58] sm:$0xff] }
   0xd   : > { %s878_s9 = scalar_lea.vmem %s1134_s0, %s745_s29  ;;  %768 = vmatpush.msra.mxu3 %v472_v10  ;;  %v467_v16 = vld [vmem:[%s1136_s2 + $0x50] sm:$0xff]  ;;  %v466_v17 = vld [vmem:[%s1136_s2 + $0x48] sm:$0xff]  ;;  %v465_v19 = vld [vmem:[%s1136_s2 + $0x40] sm:$0xff]  ;;  %s1070_s23 = scalar_lea.vmem %s1141_s7, %s745_s29 }
   0xe   : > { %v282_v1 = vld [vmem:[%s878_s9] sm:$0xff]  ;;  %v283_v2 = vld [vmem:[%s878_s9 + $0x8] sm:$0xff]  ;;  %v284_v3 = vld [vmem:[%s878_s9 + $0x10] sm:$0xff]  ;;  %478 = vmatpush.msra.mxu1 %v471_v11 }
   0xf   : > { %747 = vmatmul.msk.f32.vlgmr.msra.gmra.mxu0 %vm306_vm0, %v282_v1  ;;  %v285_v4 = vld [vmem:[%s878_s9 + $0x18] sm:$0xff]  ;;  %v286_v5 = vld [vmem:[%s878_s9 + $0x20] sm:$0xff]  ;;  %v287_v6 = vld [vmem:[%s878_s9 + $0x28] sm:$0xff]  ;;  %769 = vmatpush.msra.mxu3 %v471_v11 }
  0x10   : > { %v288_v7 = vld [vmem:[%s878_s9 + $0x30] sm:$0xff]  ;;  %v289_v8 = vld [vmem:[%s878_s9 + $0x38] sm:$0xff]  ;;  %v290_v9 = vld [vmem:[%s878_s9 + $0x40] sm:$0xff]  ;;  %479 = vmatpush.msra.mxu1 %v470_v12 }
  0x11   : > { %v291_v13 = vld [vmem:[%s878_s9 + $0x48] sm:$0xff]  ;;  %770 = vmatpush.msra.mxu3 %v470_v12  ;;  %v292_v18 = vld [vmem:[%s878_s9 + $0x50] sm:$0xff]  ;;  %v464_v20 = vld [vmem:[%s1136_s2 + $0x38] sm:$0xff] }
  0x12   : > { %480 = vmatpush.msra.mxu1 %v469_v14  ;;  %v463_v21 = vld [vmem:[%s1136_s2 + $0x30] sm:$0xff]  ;;  %v462_v22 = vld [vmem:[%s1136_s2 + $0x28] sm:$0xff]  ;;  %v293_v23 = vld [vmem:[%s878_s9 + $0x58] sm:$0xff] }
  0x13   : > { %771 = vmatpush.msra.mxu3 %v469_v14  ;;  %v461_v24 = vld [vmem:[%s1136_s2 + $0x20] sm:$0xff]  ;;  %v460_v25 = vld [vmem:[%s1136_s2 + $0x18] sm:$0xff]  ;;  %v459_v26 = vld [vmem:[%s1136_s2 + $0x10] sm:$0xff] }
  0x14   : > { %481 = vmatpush.msra.mxu1 %v468_v15  ;;  %v294_v27 = vld [vmem:[%s878_s9 + $0x60] sm:$0xff]  ;;  %v458_v28 = vld [vmem:[%s1136_s2 + $0x8] sm:$0xff]  ;;  %v296_v31 = vld [vmem:[%s878_s9 + $0x70] sm:$0xff] }
  0x15   : > { %772 = vmatpush.msra.mxu3 %v468_v15  ;;  %v457_v29 = vld [vmem:[%s1136_s2] sm:$0xff]  ;;  %v295_v30 = vld [vmem:[%s878_s9 + $0x68] sm:$0xff]  ;;  %v297_v32 = vld [vmem:[%s878_s9 + $0x78] sm:$0xff] }
  0x16   : > { %482 = vmatpush.msra.mxu1 %v467_v16  ;;  %v963_v33 = vld [vmem:[%s1138_s4] ss:$0 sm:$0xff]  ;;  %v299_v39 = vld [vmem:[%s878_s9 + $0x88] sm:$0xff]  ;;  %v300_v43 = vld [vmem:[%s878_s9 + $0x90] sm:$0xff] }
  0x17   : > { %748 = vmatmul.msk.f32.gmra.mxu0 %vm306_vm0, %v283_v2  ;;  %773 = vmatpush.msra.mxu3 %v467_v16  ;;  %v298_v35 = vld [vmem:[%s878_s9 + $0x80] sm:$0xff]  ;;  %v585_v0 = vld [vmem:[%s1137_s3 + $0x78] sm:$0xff]  ;;  %v580_v10 = vld [vmem:[%s1137_s3 + $0x50] sm:$0xff] }
  0x18   : > { %483 = vmatpush.msra.mxu1 %v466_v17  ;;  %590 = vmatpush.msra.mxu2 %v585_v0  ;;  %v579_v12 = vld [vmem:[%s1137_s3 + $0x48] sm:$0xff]  ;;  %v577_v14 = vld [vmem:[%s1137_s3 + $0x38] sm:$0xff] }
  0x19   : > { %774 = vmatpush.msra.mxu3 %v466_v17  ;;  %v576_v17 = vld [vmem:[%s1137_s3 + $0x30] sm:$0xff] }
  0x1a   : > { %484 = vmatpush.msra.mxu1 %v465_v19 }
  0x1b   : > { %775 = vmatpush.msra.mxu3 %v465_v19  ;;  %v575_v19 = vld [vmem:[%s1137_s3 + $0x28] sm:$0xff] }
  0x1c   : > { %485 = vmatpush.msra.mxu1 %v464_v20 }
  0x1d   : > { %776 = vmatpush.msra.mxu3 %v464_v20  ;;  %v574_v20 = vld [vmem:[%s1137_s3 + $0x20] sm:$0xff] }
  0x1e   : > { %486 = vmatpush.msra.mxu1 %v463_v21 }
  0x1f   : > { %749 = vmatmul.msk.f32.gmra.mxu0 %vm306_vm0, %v284_v3  ;;  %777 = vmatpush.msra.mxu3 %v463_v21  ;;  %v584_v3 = vld [vmem:[%s1137_s3 + $0x70] sm:$0xff]  ;;  %v573_v21 = vld [vmem:[%s1137_s3 + $0x18] sm:$0xff] }
  0x20   : > { %487 = vmatpush.msra.mxu1 %v462_v22  ;;  %591 = vmatpush.msra.mxu2 %v584_v3 }
  0x21   : > { %778 = vmatpush.msra.mxu3 %v462_v22 }
  0x22   : > { %488 = vmatpush.msra.mxu1 %v461_v24 }
  0x23   : > { %779 = vmatpush.msra.mxu3 %v461_v24  ;;  %v572_v24 = vld [vmem:[%s1137_s3 + $0x10] sm:$0xff] }
  0x24   : > { %489 = vmatpush.msra.mxu1 %v460_v25 }
  0x25   : > { %780 = vmatpush.msra.mxu3 %v460_v25 }
  0x26   : > { %490 = vmatpush.msra.mxu1 %v459_v26 }
  0x27   : > { %750 = vmatmul.msk.f32.gmra.mxu0 %vm306_vm0, %v285_v4  ;;  %781 = vmatpush.msra.mxu3 %v459_v26  ;;  %v571_v26 = vld [vmem:[%s1137_s3 + $0x8] sm:$0xff] }
  0x28   : > { %491 = vmatpush.msra.mxu1 %v458_v28 }
  0x29   : > { %782 = vmatpush.msra.mxu3 %v458_v28 }
  0x2a   : > { %492 = vmatpush.msra.mxu1 %v457_v29 }
  0x2b   : > { %783 = vmatpush.msra.mxu3 %v457_v29 }
  0x2d   : > { %784 = vmatpush.msrb.mxu3 %v585_v0 }
  0x2f   : > { %751 = vmatmul.msk.f32.gmra.mxu0 %vm306_vm0, %v286_v5  ;;  %785 = vmatpush.msrb.mxu3 %v584_v3  ;;  %v583_v5 = vld [vmem:[%s1137_s3 + $0x68] sm:$0xff] }
  0x30   : > { %592 = vmatpush.msra.mxu2 %v583_v5 }
  0x31   : > { %786 = vmatpush.msrb.mxu3 %v583_v5 }
  0x37   : > { %752 = vmatmul.msk.f32.gmra.mxu0 %vm306_vm0, %v287_v6  ;;  %v582_v6 = vld [vmem:[%s1137_s3 + $0x60] sm:$0xff] }
  0x38   : > { %593 = vmatpush.msra.mxu2 %v582_v6  ;;  %787 = vmatpush.msrb.mxu3 %v582_v6 }
  0x3f   : > { %753 = vmatmul.msk.f32.gmra.mxu0 %vm306_vm0, %v288_v7  ;;  %v581_v7 = vld [vmem:[%s1137_s3 + $0x58] sm:$0xff] }
  0x40   : > { %594 = vmatpush.msra.mxu2 %v581_v7  ;;  %788 = vmatpush.msrb.mxu3 %v581_v7 }
  0x42   : > { %595 = vmatpush.msra.mxu2 %v580_v10  ;;  %789 = vmatpush.msrb.mxu3 %v580_v10 }
  0x44   : > { %596 = vmatpush.msra.mxu2 %v579_v12  ;;  %790 = vmatpush.msrb.mxu3 %v579_v12 }
  0x47   : > { %754 = vmatmul.msk.f32.gmra.mxu0 %vm306_vm0, %v289_v8 }
  0x4f   : > { %755 = vmatmul.msk.f32.gmra.mxu0 %vm306_vm0, %v290_v9 }
  0x57   : > { %756 = vmatmul.msk.f32.gmra.mxu0 %vm306_vm0, %v291_v13  ;;  %v578_v13 = vld [vmem:[%s1137_s3 + $0x40] sm:$0xff] }
  0x58   : > { %597 = vmatpush.msra.mxu2 %v578_v13  ;;  %791 = vmatpush.msrb.mxu3 %v578_v13 }
  0x5a   : > { %598 = vmatpush.msra.mxu2 %v577_v14  ;;  %792 = vmatpush.msrb.mxu3 %v577_v14 }
  0x5c   : > { %599 = vmatpush.msra.mxu2 %v576_v17  ;;  %793 = vmatpush.msrb.mxu3 %v576_v17 }
  0x5e   : > { %600 = vmatpush.msra.mxu2 %v575_v19  ;;  %794 = vmatpush.msrb.mxu3 %v575_v19 }
  0x5f   : > { %757 = vmatmul.msk.f32.gmra.mxu0 %vm306_vm0, %v292_v18 }
  0x60   : > { %601 = vmatpush.msra.mxu2 %v574_v20  ;;  %795 = vmatpush.msrb.mxu3 %v574_v20 }
  0x62   : > { %602 = vmatpush.msra.mxu2 %v573_v21  ;;  %796 = vmatpush.msrb.mxu3 %v573_v21 }
  0x64   : > { %603 = vmatpush.msra.mxu2 %v572_v24  ;;  %797 = vmatpush.msrb.mxu3 %v572_v24 }
  0x66   : > { %604 = vmatpush.msra.mxu2 %v571_v26  ;;  %798 = vmatpush.msrb.mxu3 %v571_v26 }
  0x67   : > { %758 = vmatmul.msk.f32.gmra.mxu0 %vm306_vm0, %v293_v23 }
  0x6f   : > { %759 = vmatmul.msk.f32.gmra.mxu0 %vm306_vm0, %v294_v27  ;;  %v570_v27 = vld [vmem:[%s1137_s3] sm:$0xff] }
  0x70   : > { %605 = vmatpush.msra.mxu2 %v570_v27  ;;  %799 = vmatpush.msrb.mxu3 %v570_v27 }
  0x77   : > { %760 = vmatmul.msk.f32.gmra.mxu0 %vm306_vm0, %v295_v30 }
  0x7f   : > { %761 = vmatmul.msk.f32.gmra.mxu0 %vm306_vm0, %v296_v31 }
  0x87   : > { %762 = vmatmul.msk.f32.gmra.mxu0 %vm306_vm0, %v297_v32 }
  0x8c   : > { %v381_v34 = vpop.f32.mrf.mxu0 }
  0x8d   : > { %v382_v36 = vadd.f32 %v963_v33, %v381_v34 }
  0x8f   : > { %v438_v37 = vmax.f32 %v382_v36, 0.0  ;;  %763 = vmatmul.msk.f32.gmra.mxu0 %vm306_vm0, %v298_v35 }
  0x91   : > { %493 = vmatmul.f32.vlgmr.msra.gmra.mxu1 %v438_v37 }
  0x94   : > { %v384_v38 = vpop.f32.mrf.mxu0 }
  0x95   : > { %v385_v40 = vadd.f32 %v963_v33, %v384_v38  ;;  %v1038_v38 = vld [vmem:[%s1139_s5] ss:$0 sm:$0xff] }
  0x97   : > { %v439_v41 = vmax.f32 %v385_v40, 0.0  ;;  %764 = vmatmul.msk.f32.gmra.mxu0 %vm306_vm0, %v299_v39 }
  0x99   : > { %496 = vmatmul.f32.gmra.mxu1 %v439_v41 }
  0x9c   : > { %v387_v42 = vpop.f32.mrf.mxu0 }
  0x9d   : > { %v388_v44 = vadd.f32 %v963_v33, %v387_v42 }
  0x9f   : > { %v440_v45 = vmax.f32 %v388_v44, 0.0  ;;  %765 = vmatmul.msk.f32.gmra.mxu0 %vm306_vm0, %v300_v43 }
  0xa1   : > { %499 = vmatmul.f32.gmra.mxu1 %v440_v45 }
  0xa4   : > { %v390_v46 = vpop.f32.mrf.mxu0 }
  0xa5   : > { %v391_v47 = vadd.f32 %v963_v33, %v390_v46 }
  0xa7   : > { %v441_v48 = vmax.f32 %v391_v47, 0.0 }
  0xa9   : > { %502 = vmatmul.f32.gmra.mxu1 %v441_v48 }
  0xac   : > { %v393_v49 = vpop.f32.mrf.mxu0 }
  0xad   : > { %v394_v50 = vadd.f32 %v963_v33, %v393_v49 }
  0xaf   : > { %v442_v51 = vmax.f32 %v394_v50, 0.0 }
  0xb1   : > { %505 = vmatmul.f32.gmra.mxu1 %v442_v51 }
  0xb4   : > { %v396_v52 = vpop.f32.mrf.mxu0 }
  0xb5   : > { %v397_v53 = vadd.f32 %v963_v33, %v396_v52 }
  0xb7   : > { %v443_v54 = vmax.f32 %v397_v53, 0.0 }
  0xb9   : > { %508 = vmatmul.f32.gmra.mxu1 %v443_v54 }
  0xbc   : > { %v399_v55 = vpop.f32.mrf.mxu0 }
  0xbd   : > { %v400_v56 = vadd.f32 %v963_v33, %v399_v55 }
  0xbf   : > { %v444_v57 = vmax.f32 %v400_v56, 0.0 }
  0xc1   : > { %511 = vmatmul.f32.gmra.mxu1 %v444_v57 }
  0xc4   : > { %v402_v58 = vpop.f32.mrf.mxu0 }
  0xc5   : > { %v403_v59 = vadd.f32 %v963_v33, %v402_v58 }
  0xc7   : > { %v445_v60 = vmax.f32 %v403_v59, 0.0 }
  0xc9   : > { %514 = vmatmul.f32.gmra.mxu1 %v445_v60 }
  0xcc   : > { %v405_v61 = vpop.f32.mrf.mxu0 }
  0xcd   : > { %v406_v62 = vadd.f32 %v963_v33, %v405_v61 }
  0xcf   : > { %v446_v63 = vmax.f32 %v406_v62, 0.0 }
  0xd1   : > { %517 = vmatmul.f32.gmra.mxu1 %v446_v63 }
  0xd4   : > { %v408_v1 = vpop.f32.mrf.mxu0 }
  0xd5   : > { %v409_v2 = vadd.f32 %v963_v33, %v408_v1 }
  0xd7   : > { %v447_v4 = vmax.f32 %v409_v2, 0.0 }
  0xd9   : > { %520 = vmatmul.f32.gmra.mxu1 %v447_v4 }
  0xdc   : > { %v411_v8 = vpop.f32.mrf.mxu0 }
  0xdd   : > { %v412_v9 = vadd.f32 %v963_v33, %v411_v8 }
  0xdf   : > { %v448_v11 = vmax.f32 %v412_v9, 0.0 }
  0xe1   : > { %523 = vmatmul.f32.gmra.mxu1 %v448_v11 }
  0xe4   : > { %v414_v15 = vpop.f32.mrf.mxu0 }
  0xe5   : > { %v415_v16 = vadd.f32 %v963_v33, %v414_v15 }
  0xe7   : > { %v449_v18 = vmax.f32 %v415_v16, 0.0 }
  0xe9   : > { %526 = vmatmul.f32.gmra.mxu1 %v449_v18 }
  0xec   : > { %v417_v22 = vpop.f32.mrf.mxu0 }
  0xed   : > { %v418_v23 = vadd.f32 %v963_v33, %v417_v22 }
  0xef   : > { %v450_v25 = vmax.f32 %v418_v23, 0.0 }
  0xf1   : > { %529 = vmatmul.f32.gmra.mxu1 %v450_v25 }
  0xf4   : > { %v420_v28 = vpop.f32.mrf.mxu0 }
  0xf5   : > { %v421_v29 = vadd.f32 %v963_v33, %v420_v28 }
  0xf7   : > { %v451_v30 = vmax.f32 %v421_v29, 0.0 }
  0xf9   : > { %532 = vmatmul.f32.gmra.mxu1 %v451_v30 }
  0xfc   : > { %v423_v31 = vpop.f32.mrf.mxu0 }
  0xfd   : > { %v424_v32 = vadd.f32 %v963_v33, %v423_v31  ;;  %v1062_v31 = vld [vmem:[%s1140_s6] ss:$0 sm:$0xff] }
  0xff   : > { %v452_v34 = vmax.f32 %v424_v32, 0.0 }
 0x101   : > { %535 = vmatmul.f32.vlgmr.msra.gmra.mxu3 %v452_v34 }
 0x104   : > { %v426_v35 = vpop.f32.mrf.mxu0 }
 0x105   : > { %v427_v36 = vadd.f32 %v963_v33, %v426_v35 }
 0x107   : > { %v453_v37 = vmax.f32 %v427_v36, 0.0 }
 0x109   : > { %538 = vmatmul.f32.gmra.mxu3 %v453_v37 }
 0x10c   : > { %v429_v39 = vpop.f32.mrf.mxu0 }
 0x10d   : > { %v430_v40 = vadd.f32 %v963_v33, %v429_v39 }
 0x10e   : > { %v494_v41 = vpop.f32.mrf.mxu1 }
 0x10f   : > { %v454_v42 = vmax.f32 %v430_v40, 0.0  ;;  %v495_v43 = vadd.f32 %v1038_v38, %v494_v41 }
 0x111   : > { %v551_v44 = vmax.f32 %v495_v43, 0.0  ;;  %541 = vmatmul.f32.gmra.mxu3 %v454_v42 }
 0x113   : > { %606 = vmatmul.f32.vlgmr.msra.gmra.mxu2 %v551_v44 }
 0x114   : > { %v432_v45 = vpop.f32.mrf.mxu0 }
 0x115   : > { %v433_v46 = vadd.f32 %v963_v33, %v432_v45 }
 0x116   : > { %v497_v47 = vpop.f32.mrf.mxu1 }
 0x117   : > { %v455_v48 = vmax.f32 %v433_v46, 0.0  ;;  %v498_v49 = vadd.f32 %v1038_v38, %v497_v47 }
 0x119   : > { %v552_v50 = vmax.f32 %v498_v49, 0.0  ;;  %544 = vmatmul.f32.gmra.mxu3 %v455_v48 }
 0x11b   : > { %609 = vmatmul.f32.gmra.mxu2 %v552_v50 }
 0x11c   : > { %v435_v51 = vpop.f32.mrf.mxu0 }
 0x11d   : > { %v436_v52 = vadd.f32 %v963_v33, %v435_v51 }
 0x11e   : > { %v500_v53 = vpop.f32.mrf.mxu1 }
 0x11f   : > { %v456_v54 = vmax.f32 %v436_v52, 0.0  ;;  %v501_v55 = vadd.f32 %v1038_v38, %v500_v53 }
 0x121   : > { %v553_v56 = vmax.f32 %v501_v55, 0.0  ;;  %547 = vmatmul.f32.gmra.mxu3 %v456_v54 }
 0x123   : > { %612 = vmatmul.f32.gmra.mxu2 %v553_v56 }
 0x126   : > { %v503_v57 = vpop.f32.mrf.mxu1 }
 0x127   : > { %v504_v58 = vadd.f32 %v1038_v38, %v503_v57 }
 0x129   : > { %v554_v59 = vmax.f32 %v504_v58, 0.0 }
 0x12b   : > { %615 = vmatmul.f32.gmra.mxu2 %v554_v59 }
 0x12e   : > { %v506_v60 = vpop.f32.mrf.mxu1 }
 0x12f   : > { %v507_v61 = vadd.f32 %v1038_v38, %v506_v60 }
 0x131   : > { %v555_v62 = vmax.f32 %v507_v61, 0.0 }
 0x133   : > { %618 = vmatmul.f32.gmra.mxu2 %v555_v62 }
 0x136   : > { %v509_v63 = vpop.f32.mrf.mxu1 }
 0x137   : > { %v510_v33 = vadd.f32 %v1038_v38, %v509_v63 }
 0x139   : > { %v556_v0 = vmax.f32 %v510_v33, 0.0 }
 0x13b   : > { %621 = vmatmul.f32.gmra.mxu2 %v556_v0 }
 0x13e   : > { %v512_v1 = vpop.f32.mrf.mxu1 }
 0x13f   : > { %v513_v2 = vadd.f32 %v1038_v38, %v512_v1 }
 0x141   : > { %v557_v3 = vmax.f32 %v513_v2, 0.0 }
 0x143   : > { %624 = vmatmul.f32.gmra.mxu2 %v557_v3 }
 0x146   : > { %v515_v4 = vpop.f32.mrf.mxu1 }
 0x147   : > { %v516_v5 = vadd.f32 %v1038_v38, %v515_v4 }
 0x149   : > { %v558_v6 = vmax.f32 %v516_v5, 0.0 }
 0x14b   : > { %627 = vmatmul.f32.gmra.mxu2 %v558_v6 }
 0x14e   : > { %v518_v7 = vpop.f32.mrf.mxu1 }
 0x14f   : > { %v519_v8 = vadd.f32 %v1038_v38, %v518_v7 }
 0x151   : > { %v559_v9 = vmax.f32 %v519_v8, 0.0 }
 0x153   : > { %630 = vmatmul.f32.gmra.mxu2 %v559_v9 }
 0x156   : > { %v521_v10 = vpop.f32.mrf.mxu1 }
 0x157   : > { %v522_v11 = vadd.f32 %v1038_v38, %v521_v10 }
 0x159   : > { %v560_v12 = vmax.f32 %v522_v11, 0.0 }
 0x15b   : > { %633 = vmatmul.f32.gmra.mxu2 %v560_v12 }
 0x15e   : > { %v524_v13 = vpop.f32.mrf.mxu1 }
 0x15f   : > { %v525_v14 = vadd.f32 %v1038_v38, %v524_v13 }
 0x161   : > { %v561_v15 = vmax.f32 %v525_v14, 0.0 }
 0x163   : > { %636 = vmatmul.f32.gmra.mxu2 %v561_v15 }
 0x166   : > { %v527_v16 = vpop.f32.mrf.mxu1 }
 0x167   : > { %v528_v17 = vadd.f32 %v1038_v38, %v527_v16 }
 0x169   : > { %v562_v18 = vmax.f32 %v528_v17, 0.0 }
 0x16b   : > { %639 = vmatmul.f32.gmra.mxu2 %v562_v18 }
 0x16e   : > { %v530_v19 = vpop.f32.mrf.mxu1 }
 0x16f   : > { %v531_v20 = vadd.f32 %v1038_v38, %v530_v19 }
 0x171   : > { %v563_v21 = vmax.f32 %v531_v20, 0.0 }
 0x173   : > { %642 = vmatmul.f32.gmra.mxu2 %v563_v21 }
 0x176   : > { %v533_v22 = vpop.f32.mrf.mxu1 }
 0x177   : > { %v534_v23 = vadd.f32 %v1038_v38, %v533_v22 }
 0x179   : > { %v564_v24 = vmax.f32 %v534_v23, 0.0 }
 0x17b   : > { %645 = vmatmul.f32.gmra.mxu2 %v564_v24 }
 0x184   : > { %v536_v25 = vpop.f32.mrf.mxu3 }
 0x185   : > { %v537_v26 = vadd.f32 %v1038_v38, %v536_v25 }
 0x187   : > { %v565_v27 = vmax.f32 %v537_v26, 0.0 }
 0x189   : > { %648 = vmatmul.f32.vlgmr.msrb.gmra.mxu3 %v565_v27 }
 0x18c   : > { %v539_v28 = vpop.f32.mrf.mxu3 }
 0x18d   : > { %v540_v29 = vadd.f32 %v1038_v38, %v539_v28 }
 0x18f   : > { %v566_v30 = vmax.f32 %v540_v29, 0.0 }
 0x191   : > { %651 = vmatmul.f32.gmra.mxu3 %v566_v30 }
 0x194   : > { %v542_v32 = vpop.f32.mrf.mxu3 }
 0x195   : > { %v543_v34 = vadd.f32 %v1038_v38, %v542_v32 }
 0x196   : > { %v607_v35 = vpop.f32.mrf.mxu2 }
 0x197   : > { %v567_v36 = vmax.f32 %v543_v34, 0.0  ;;  %v608_v37 = vadd.f32 %v1062_v31, %v607_v35 }
 0x199   : > { %665 = vst.msk [vmem:[%s1070_s23] sm:$0xff] %vm664_vm1, %v608_v37  ;;  %654 = vmatmul.f32.gmra.mxu3 %v567_v36 }
 0x19c   : > { %v545_v39 = vpop.f32.mrf.mxu3 }
 0x19d   : > { %v546_v40 = vadd.f32 %v1038_v38, %v545_v39 }
 0x19e   : > { %v610_v41 = vpop.f32.mrf.mxu2 }
 0x19f   : > { %v568_v42 = vmax.f32 %v546_v40, 0.0  ;;  %v611_v43 = vadd.f32 %v1062_v31, %v610_v41 }
 0x1a1   : > { %666 = vst.msk [vmem:[%s1070_s23 + $0x8] sm:$0xff] %vm664_vm1, %v611_v43  ;;  %657 = vmatmul.f32.gmra.mxu3 %v568_v42 }
 0x1a4   : > { %v548_v44 = vpop.f32.mrf.mxu3 }
 0x1a5   : > { %v549_v45 = vadd.f32 %v1038_v38, %v548_v44 }
 0x1a6   : > { %v613_v46 = vpop.f32.mrf.mxu2 }
 0x1a7   : > { %v569_v47 = vmax.f32 %v549_v45, 0.0  ;;  %v614_v48 = vadd.f32 %v1062_v31, %v613_v46 }
 0x1a9   : > { %667 = vst.msk [vmem:[%s1070_s23 + $0x10] sm:$0xff] %vm664_vm1, %v614_v48  ;;  %660 = vmatmul.f32.gmra.mxu3 %v569_v47 }
 0x1ae   : > { %v616_v49 = vpop.f32.mrf.mxu2 }
 0x1af   : > { %v617_v50 = vadd.f32 %v1062_v31, %v616_v49 }
 0x1b1   : > { %668 = vst.msk [vmem:[%s1070_s23 + $0x18] sm:$0xff] %vm664_vm1, %v617_v50 }
 0x1b6   : > { %v619_v51 = vpop.f32.mrf.mxu2 }
 0x1b7   : > { %v620_v52 = vadd.f32 %v1062_v31, %v619_v51 }
 0x1b9   : > { %669 = vst.msk [vmem:[%s1070_s23 + $0x20] sm:$0xff] %vm664_vm1, %v620_v52 }
 0x1be   : > { %v622_v38 = vpop.f32.mrf.mxu2 }
 0x1bf   : > { %v623_v53 = vadd.f32 %v1062_v31, %v622_v38 }
 0x1c1   : > { %670 = vst.msk [vmem:[%s1070_s23 + $0x28] sm:$0xff] %vm664_vm1, %v623_v53 }
 0x1c6   : > { %v625_v54 = vpop.f32.mrf.mxu2 }
 0x1c7   : > { %v626_v55 = vadd.f32 %v1062_v31, %v625_v54 }
 0x1c9   : > { %671 = vst.msk [vmem:[%s1070_s23 + $0x30] sm:$0xff] %vm664_vm1, %v626_v55 }
 0x1ce   : > { %v628_v56 = vpop.f32.mrf.mxu2 }
 0x1cf   : > { %v629_v57 = vadd.f32 %v1062_v31, %v628_v56 }
 0x1d1   : > { %672 = vst.msk [vmem:[%s1070_s23 + $0x38] sm:$0xff] %vm664_vm1, %v629_v57 }
 0x1d6   : > { %v631_v58 = vpop.f32.mrf.mxu2 }
 0x1d7   : > { %v632_v59 = vadd.f32 %v1062_v31, %v631_v58 }
 0x1d9   : > { %673 = vst.msk [vmem:[%s1070_s23 + $0x40] sm:$0xff] %vm664_vm1, %v632_v59 }
 0x1de   : > { %v634_v60 = vpop.f32.mrf.mxu2 }
 0x1df   : > { %v635_v61 = vadd.f32 %v1062_v31, %v634_v60 }
 0x1e1   : > { %674 = vst.msk [vmem:[%s1070_s23 + $0x48] sm:$0xff] %vm664_vm1, %v635_v61 }
 0x1e6   : > { %v637_v62 = vpop.f32.mrf.mxu2 }
 0x1e7   : > { %v638_v63 = vadd.f32 %v1062_v31, %v637_v62 }
 0x1e9   : > { %675 = vst.msk [vmem:[%s1070_s23 + $0x50] sm:$0xff] %vm664_vm1, %v638_v63 }
 0x1ee   : > { %v640_v33 = vpop.f32.mrf.mxu2 }
 0x1ef   : > { %v641_v0 = vadd.f32 %v1062_v31, %v640_v33 }
 0x1f1   : > { %676 = vst.msk [vmem:[%s1070_s23 + $0x58] sm:$0xff] %vm664_vm1, %v641_v0 }
 0x1f6   : > { %v643_v1 = vpop.f32.mrf.mxu2 }
 0x1f7   : > { %v644_v2 = vadd.f32 %v1062_v31, %v643_v1 }
 0x1f9   : > { %677 = vst.msk [vmem:[%s1070_s23 + $0x60] sm:$0xff] %vm664_vm1, %v644_v2 }
 0x1fe   : > { %v646_v3 = vpop.f32.mrf.mxu2 }
 0x1ff   : > { %v647_v4 = vadd.f32 %v1062_v31, %v646_v3 }
 0x201   : > { %678 = vst.msk [vmem:[%s1070_s23 + $0x68] sm:$0xff] %vm664_vm1, %v647_v4 }
 0x20c   : > { %v649_v5 = vpop.f32.mrf.mxu3 }
 0x20d   : > { %v650_v6 = vadd.f32 %v1062_v31, %v649_v5 }
 0x20f   : > { %679 = vst.msk [vmem:[%s1070_s23 + $0x70] sm:$0xff] %vm664_vm1, %v650_v6 }
 0x214   : > { %v652_v7 = vpop.f32.mrf.mxu3 }
 0x215   : > { %v653_v8 = vadd.f32 %v1062_v31, %v652_v7 }
 0x217   : > { %680 = vst.msk [vmem:[%s1070_s23 + $0x78] sm:$0xff] %vm664_vm1, %v653_v8 }
 0x21c   : > { %v655_v9 = vpop.f32.mrf.mxu3 }
 0x21d   : > { %v656_v10 = vadd.f32 %v1062_v31, %v655_v9 }
 0x21f   : > { %681 = vst.msk [vmem:[%s1070_s23 + $0x80] sm:$0xff] %vm664_vm1, %v656_v10 }
 0x224   : > { %v658_v11 = vpop.f32.mrf.mxu3 }
 0x225   : > { %v659_v12 = vadd.f32 %v1062_v31, %v658_v11 }
 0x227   : > { %682 = vst.msk [vmem:[%s1070_s23 + $0x88] sm:$0xff] %vm664_vm1, %v659_v12 }
 0x22c   : > { %v661_v13 = vpop.f32.mrf.mxu3 }
 0x22d   : > { %v662_v14 = vadd.f32 %v1062_v31, %v661_v13 }
 0x22f   : > { %683 = vst.msk [vmem:[%s1070_s23 + $0x90] sm:$0xff] %vm664_vm1, %v662_v14 }
 0x230 PF: > { %s17_s24 = sadd.s32 1, %s817_s24  }
 0x231   : > { %p14_p4 = scmp.ge.s32.totalorder %s17_s24, 4  }
 0x233   :  { %16 = sbr.rel (!%p14_p4) target bundleno = 1 (0x1), region = 78 }

// kernel: tpu_custom_call.1
= control target key start
LH: loop header
LB: loop body
LE: loop exit
PB: predicated region body
PF: predicated region fallthrough
CT: control target
= control target key end

     0   :  { %s859_s24 = smov 0   ;;  %s1134_s0 = inlined_call_operand.vmem [shape: f32[300,8], index: 0, kind: input, shape index: {}]   ;;  %s1135_s1 = inlined_call_operand.vmem [shape: f32[8,128], index: 1, kind: input, shape index: {}]   ;;  %s1136_s2 = inlined_call_operand.vmem [shape: f32[128,128], index: 2, kind: input, shape index: {}]   ;;  %s1137_s3 = inlined_call_operand.vmem [shape: f32[128,24], index: 3, kind: input, shape index: {}]   ;;  %s1138_s4 = inlined_call_operand.vmem [shape: f32[1,128], index: 4, kind: input, shape index: {}]   ;;  %s1139_s5 = inlined_call_operand.vmem [shape: f32[1,128], index: 5, kind: input, shape index: {}]   ;;  %s1140_s6 = inlined_call_operand.vmem [shape: f32[1,24], index: 6, kind: input, shape index: {}]   ;;  %s1141_s7 = inlined_call_operand.vmem [shape: f32[300,24], index: 7, kind: output, shape index: {}]  }
   0x1 LB: > { %s740_s25 = sadd.s32 4294967295, %s817_s24   ;;  %p744_p0 = scmp.ge.s32.totalorder %s817_s24, 1  ;;  %s817_s24 = sphi %s859_s24, %s17_s24  }
   0x2   : > { %p238_p1 = scmp.lt.s32.totalorder %s817_s24, 3 }
   0x4   : > { %p239_p2 = pnand %p744_p0, %p238_p1 }
   0x5   : > { %s270_s28 = smul.u32 (!%p239_p2), 19, %s740_s25 }
   0x6   : > { %242 = sbr.rel (%p239_p2) target bundleno = 560 (0x230), region = 48 }
   0x7   : > { %p271_p3 = scmp.lt.s32.totalorder (!%p239_p2), %s270_s28, 37 }
   0xb   : > { %v301_v0 = vld [vmem:[%s1135_s1] sm:$0xff]  ;;  %s1143_s28 = smov (!%p271_p3, %s270_s28), 37  ;;  %vm306_vm0 = vcmask 64512   ;;  %v472_v10 = vld [vmem:[%s1136_s2 + $0x78] sm:$0xff]  ;;  %v471_v11 = vld [vmem:[%s1136_s2 + $0x70] sm:$0xff]  ;;  %vm664_vm1 = vcmask 195584  }
   0xc   : > { %379 = vmatpush.msra.mxu0 %v301_v0  ;;  %s745_s29 = sshll.u32 %s1143_s28, 3  ;;  %477 = vmatpush.msra.mxu1 %v472_v10  ;;  %v470_v12 = vld [vmem:[%s1136_s2 + $0x68] sm:$0xff]  ;;  %v469_v14 = vld [vmem:[%s1136_s2 + $0x60] sm:$0xff]  ;;  %v468_v15 = vld [vmem:[%s1136_s2 + $0x58] sm:$0xff] }
   0xd   : > { %s878_s9 = scalar_lea.vmem %s1134_s0, %s745_s29  ;;  %768 = vmatpush.msra.mxu3 %v472_v10  ;;  %v467_v16 = vld [vmem:[%s1136_s2 + $0x50] sm:$0xff]  ;;  %v466_v17 = vld [vmem:[%s1136_s2 + $0x48] sm:$0xff]  ;;  %v465_v19 = vld [vmem:[%s1136_s2 + $0x40] sm:$0xff]  ;;  %s1070_s23 = scalar_lea.vmem %s1141_s7, %s745_s29 }
   0xe   : > { %v282_v1 = vld [vmem:[%s878_s9] sm:$0xff]  ;;  %v283_v2 = vld [vmem:[%s878_s9 + $0x8] sm:$0xff]  ;;  %v284_v3 = vld [vmem:[%s878_s9 + $0x10] sm:$0xff]  ;;  %478 = vmatpush.msra.mxu1 %v471_v11 }
   0xf   : > { %747 = vmatmul.msk.f32.vlgmr.msra.gmra.mxu0 %vm306_vm0, %v282_v1  ;;  %v285_v4 = vld [vmem:[%s878_s9 + $0x18] sm:$0xff]  ;;  %v286_v5 = vld [vmem:[%s878_s9 + $0x20] sm:$0xff]  ;;  %v287_v6 = vld [vmem:[%s878_s9 + $0x28] sm:$0xff]  ;;  %769 = vmatpush.msra.mxu3 %v471_v11 }
  0x10   : > { %v288_v7 = vld [vmem:[%s878_s9 + $0x30] sm:$0xff]  ;;  %v289_v8 = vld [vmem:[%s878_s9 + $0x38] sm:$0xff]  ;;  %v290_v9 = vld [vmem:[%s878_s9 + $0x40] sm:$0xff]  ;;  %479 = vmatpush.msra.mxu1 %v470_v12 }
  0x11   : > { %v291_v13 = vld [vmem:[%s878_s9 + $0x48] sm:$0xff]  ;;  %770 = vmatpush.msra.mxu3 %v470_v12  ;;  %v292_v18 = vld [vmem:[%s878_s9 + $0x50] sm:$0xff]  ;;  %v464_v20 = vld [vmem:[%s1136_s2 + $0x38] sm:$0xff] }
  0x12   : > { %480 = vmatpush.msra.mxu1 %v469_v14  ;;  %v463_v21 = vld [vmem:[%s1136_s2 + $0x30] sm:$0xff]  ;;  %v462_v22 = vld [vmem:[%s1136_s2 + $0x28] sm:$0xff]  ;;  %v293_v23 = vld [vmem:[%s878_s9 + $0x58] sm:$0xff] }
  0x13   : > { %771 = vmatpush.msra.mxu3 %v469_v14  ;;  %v461_v24 = vld [vmem:[%s1136_s2 + $0x20] sm:$0xff]  ;;  %v460_v25 = vld [vmem:[%s1136_s2 + $0x18] sm:$0xff]  ;;  %v459_v26 = vld [vmem:[%s1136_s2 + $0x10] sm:$0xff] }
  0x14   : > { %481 = vmatpush.msra.mxu1 %v468_v15  ;;  %v294_v27 = vld [vmem:[%s878_s9 + $0x60] sm:$0xff]  ;;  %v458_v28 = vld [vmem:[%s1136_s2 + $0x8] sm:$0xff]  ;;  %v296_v31 = vld [vmem:[%s878_s9 + $0x70] sm:$0xff] }
  0x15   : > { %772 = vmatpush.msra.mxu3 %v468_v15  ;;  %v457_v29 = vld [vmem:[%s1136_s2] sm:$0xff]  ;;  %v295_v30 = vld [vmem:[%s878_s9 + $0x68] sm:$0xff]  ;;  %v297_v32 = vld [vmem:[%s878_s9 + $0x78] sm:$0xff] }
  0x16   : > { %482 = vmatpush.msra.mxu1 %v467_v16  ;;  %v963_v33 = vld [vmem:[%s1138_s4] ss:$0 sm:$0xff]  ;;  %v299_v39 = vld [vmem:[%s878_s9 + $0x88] sm:$0xff]  ;;  %v300_v43 = vld [vmem:[%s878_s9 + $0x90] sm:$0xff] }
  0x17   : > { %748 = vmatmul.msk.f32.gmra.mxu0 %vm306_vm0, %v283_v2  ;;  %773 = vmatpush.msra.mxu3 %v467_v16  ;;  %v298_v35 = vld [vmem:[%s878_s9 + $0x80] sm:$0xff]  ;;  %v585_v0 = vld [vmem:[%s1137_s3 + $0x78] sm:$0xff]  ;;  %v580_v10 = vld [vmem:[%s1137_s3 + $0x50] sm:$0xff] }
  0x18   : > { %483 = vmatpush.msra.mxu1 %v466_v17  ;;  %590 = vmatpush.msra.mxu2 %v585_v0  ;;  %v579_v12 = vld [vmem:[%s1137_s3 + $0x48] sm:$0xff]  ;;  %v577_v14 = vld [vmem:[%s1137_s3 + $0x38] sm:$0xff] }
  0x19   : > { %774 = vmatpush.msra.mxu3 %v466_v17  ;;  %v576_v17 = vld [vmem:[%s1137_s3 + $0x30] sm:$0xff] }
  0x1a   : > { %484 = vmatpush.msra.mxu1 %v465_v19 }
  0x1b   : > { %775 = vmatpush.msra.mxu3 %v465_v19  ;;  %v575_v19 = vld [vmem:[%s1137_s3 + $0x28] sm:$0xff] }
  0x1c   : > { %485 = vmatpush.msra.mxu1 %v464_v20 }
  0x1d   : > { %776 = vmatpush.msra.mxu3 %v464_v20  ;;  %v574_v20 = vld [vmem:[%s1137_s3 + $0x20] sm:$0xff] }
  0x1e   : > { %486 = vmatpush.msra.mxu1 %v463_v21 }
  0x1f   : > { %749 = vmatmul.msk.f32.gmra.mxu0 %vm306_vm0, %v284_v3  ;;  %777 = vmatpush.msra.mxu3 %v463_v21  ;;  %v584_v3 = vld [vmem:[%s1137_s3 + $0x70] sm:$0xff]  ;;  %v573_v21 = vld [vmem:[%s1137_s3 + $0x18] sm:$0xff] }
  0x20   : > { %487 = vmatpush.msra.mxu1 %v462_v22  ;;  %591 = vmatpush.msra.mxu2 %v584_v3 }
  0x21   : > { %778 = vmatpush.msra.mxu3 %v462_v22 }
  0x22   : > { %488 = vmatpush.msra.mxu1 %v461_v24 }
  0x23   : > { %779 = vmatpush.msra.mxu3 %v461_v24  ;;  %v572_v24 = vld [vmem:[%s1137_s3 + $0x10] sm:$0xff] }
  0x24   : > { %489 = vmatpush.msra.mxu1 %v460_v25 }
  0x25   : > { %780 = vmatpush.msra.mxu3 %v460_v25 }
  0x26   : > { %490 = vmatpush.msra.mxu1 %v459_v26 }
  0x27   : > { %750 = vmatmul.msk.f32.gmra.mxu0 %vm306_vm0, %v285_v4  ;;  %781 = vmatpush.msra.mxu3 %v459_v26  ;;  %v571_v26 = vld [vmem:[%s1137_s3 + $0x8] sm:$0xff] }
  0x28   : > { %491 = vmatpush.msra.mxu1 %v458_v28 }
  0x29   : > { %782 = vmatpush.msra.mxu3 %v458_v28 }
  0x2a   : > { %492 = vmatpush.msra.mxu1 %v457_v29 }
  0x2b   : > { %783 = vmatpush.msra.mxu3 %v457_v29 }
  0x2d   : > { %784 = vmatpush.msrb.mxu3 %v585_v0 }
  0x2f   : > { %751 = vmatmul.msk.f32.gmra.mxu0 %vm306_vm0, %v286_v5  ;;  %785 = vmatpush.msrb.mxu3 %v584_v3  ;;  %v583_v5 = vld [vmem:[%s1137_s3 + $0x68] sm:$0xff] }
  0x30   : > { %592 = vmatpush.msra.mxu2 %v583_v5 }
  0x31   : > { %786 = vmatpush.msrb.mxu3 %v583_v5 }
  0x37   : > { %752 = vmatmul.msk.f32.gmra.mxu0 %vm306_vm0, %v287_v6  ;;  %v582_v6 = vld [vmem:[%s1137_s3 + $0x60] sm:$0xff] }
  0x38   : > { %593 = vmatpush.msra.mxu2 %v582_v6  ;;  %787 = vmatpush.msrb.mxu3 %v582_v6 }
  0x3f   : > { %753 = vmatmul.msk.f32.gmra.mxu0 %vm306_vm0, %v288_v7  ;;  %v581_v7 = vld [vmem:[%s1137_s3 + $0x58] sm:$0xff] }
  0x40   : > { %594 = vmatpush.msra.mxu2 %v581_v7  ;;  %788 = vmatpush.msrb.mxu3 %v581_v7 }
  0x42   : > { %595 = vmatpush.msra.mxu2 %v580_v10  ;;  %789 = vmatpush.msrb.mxu3 %v580_v10 }
  0x44   : > { %596 = vmatpush.msra.mxu2 %v579_v12  ;;  %790 = vmatpush.msrb.mxu3 %v579_v12 }
  0x47   : > { %754 = vmatmul.msk.f32.gmra.mxu0 %vm306_vm0, %v289_v8 }
  0x4f   : > { %755 = vmatmul.msk.f32.gmra.mxu0 %vm306_vm0, %v290_v9 }
  0x57   : > { %756 = vmatmul.msk.f32.gmra.mxu0 %vm306_vm0, %v291_v13  ;;  %v578_v13 = vld [vmem:[%s1137_s3 + $0x40] sm:$0xff] }
  0x58   : > { %597 = vmatpush.msra.mxu2 %v578_v13  ;;  %791 = vmatpush.msrb.mxu3 %v578_v13 }
  0x5a   : > { %598 = vmatpush.msra.mxu2 %v577_v14  ;;  %792 = vmatpush.msrb.mxu3 %v577_v14 }
  0x5c   : > { %599 = vmatpush.msra.mxu2 %v576_v17  ;;  %793 = vmatpush.msrb.mxu3 %v576_v17 }
  0x5e   : > { %600 = vmatpush.msra.mxu2 %v575_v19  ;;  %794 = vmatpush.msrb.mxu3 %v575_v19 }
  0x5f   : > { %757 = vmatmul.msk.f32.gmra.mxu0 %vm306_vm0, %v292_v18 }
  0x60   : > { %601 = vmatpush.msra.mxu2 %v574_v20  ;;  %795 = vmatpush.msrb.mxu3 %v574_v20 }
  0x62   : > { %602 = vmatpush.msra.mxu2 %v573_v21  ;;  %796 = vmatpush.msrb.mxu3 %v573_v21 }
  0x64   : > { %603 = vmatpush.msra.mxu2 %v572_v24  ;;  %797 = vmatpush.msrb.mxu3 %v572_v24 }
  0x66   : > { %604 = vmatpush.msra.mxu2 %v571_v26  ;;  %798 = vmatpush.msrb.mxu3 %v571_v26 }
  0x67   : > { %758 = vmatmul.msk.f32.gmra.mxu0 %vm306_vm0, %v293_v23 }
  0x6f   : > { %759 = vmatmul.msk.f32.gmra.mxu0 %vm306_vm0, %v294_v27  ;;  %v570_v27 = vld [vmem:[%s1137_s3] sm:$0xff] }
  0x70   : > { %605 = vmatpush.msra.mxu2 %v570_v27  ;;  %799 = vmatpush.msrb.mxu3 %v570_v27 }
  0x77   : > { %760 = vmatmul.msk.f32.gmra.mxu0 %vm306_vm0, %v295_v30 }
  0x7f   : > { %761 = vmatmul.msk.f32.gmra.mxu0 %vm306_vm0, %v296_v31 }
  0x87   : > { %762 = vmatmul.msk.f32.gmra.mxu0 %vm306_vm0, %v297_v32 }
  0x8c   : > { %v381_v34 = vpop.f32.mrf.mxu0 }
  0x8d   : > { %v382_v36 = vadd.f32 %v963_v33, %v381_v34 }
  0x8f   : > { %v438_v37 = vmax.f32 %v382_v36, 0.0  ;;  %763 = vmatmul.msk.f32.gmra.mxu0 %vm306_vm0, %v298_v35 }
  0x91   : > { %493 = vmatmul.f32.vlgmr.msra.gmra.mxu1 %v438_v37 }
  0x94   : > { %v384_v38 = vpop.f32.mrf.mxu0 }
  0x95   : > { %v385_v40 = vadd.f32 %v963_v33, %v384_v38  ;;  %v1038_v38 = vld [vmem:[%s1139_s5] ss:$0 sm:$0xff] }
  0x97   : > { %v439_v41 = vmax.f32 %v385_v40, 0.0  ;;  %764 = vmatmul.msk.f32.gmra.mxu0 %vm306_vm0, %v299_v39 }
  0x99   : > { %496 = vmatmul.f32.gmra.mxu1 %v439_v41 }
  0x9c   : > { %v387_v42 = vpop.f32.mrf.mxu0 }
  0x9d   : > { %v388_v44 = vadd.f32 %v963_v33, %v387_v42 }
  0x9f   : > { %v440_v45 = vmax.f32 %v388_v44, 0.0  ;;  %765 = vmatmul.msk.f32.gmra.mxu0 %vm306_vm0, %v300_v43 }
  0xa1   : > { %499 = vmatmul.f32.gmra.mxu1 %v440_v45 }
  0xa4   : > { %v390_v46 = vpop.f32.mrf.mxu0 }
  0xa5   : > { %v391_v47 = vadd.f32 %v963_v33, %v390_v46 }
  0xa7   : > { %v441_v48 = vmax.f32 %v391_v47, 0.0 }
  0xa9   : > { %502 = vmatmul.f32.gmra.mxu1 %v441_v48 }
  0xac   : > { %v393_v49 = vpop.f32.mrf.mxu0 }
  0xad   : > { %v394_v50 = vadd.f32 %v963_v33, %v393_v49 }
  0xaf   : > { %v442_v51 = vmax.f32 %v394_v50, 0.0 }
  0xb1   : > { %505 = vmatmul.f32.gmra.mxu1 %v442_v51 }
  0xb4   : > { %v396_v52 = vpop.f32.mrf.mxu0 }
  0xb5   : > { %v397_v53 = vadd.f32 %v963_v33, %v396_v52 }
  0xb7   : > { %v443_v54 = vmax.f32 %v397_v53, 0.0 }
  0xb9   : > { %508 = vmatmul.f32.gmra.mxu1 %v443_v54 }
  0xbc   : > { %v399_v55 = vpop.f32.mrf.mxu0 }
  0xbd   : > { %v400_v56 = vadd.f32 %v963_v33, %v399_v55 }
  0xbf   : > { %v444_v57 = vmax.f32 %v400_v56, 0.0 }
  0xc1   : > { %511 = vmatmul.f32.gmra.mxu1 %v444_v57 }
  0xc4   : > { %v402_v58 = vpop.f32.mrf.mxu0 }
  0xc5   : > { %v403_v59 = vadd.f32 %v963_v33, %v402_v58 }
  0xc7   : > { %v445_v60 = vmax.f32 %v403_v59, 0.0 }
  0xc9   : > { %514 = vmatmul.f32.gmra.mxu1 %v445_v60 }
  0xcc   : > { %v405_v61 = vpop.f32.mrf.mxu0 }
  0xcd   : > { %v406_v62 = vadd.f32 %v963_v33, %v405_v61 }
  0xcf   : > { %v446_v63 = vmax.f32 %v406_v62, 0.0 }
  0xd1   : > { %517 = vmatmul.f32.gmra.mxu1 %v446_v63 }
  0xd4   : > { %v408_v1 = vpop.f32.mrf.mxu0 }
  0xd5   : > { %v409_v2 = vadd.f32 %v963_v33, %v408_v1 }
  0xd7   : > { %v447_v4 = vmax.f32 %v409_v2, 0.0 }
  0xd9   : > { %520 = vmatmul.f32.gmra.mxu1 %v447_v4 }
  0xdc   : > { %v411_v8 = vpop.f32.mrf.mxu0 }
  0xdd   : > { %v412_v9 = vadd.f32 %v963_v33, %v411_v8 }
  0xdf   : > { %v448_v11 = vmax.f32 %v412_v9, 0.0 }
  0xe1   : > { %523 = vmatmul.f32.gmra.mxu1 %v448_v11 }
  0xe4   : > { %v414_v15 = vpop.f32.mrf.mxu0 }
  0xe5   : > { %v415_v16 = vadd.f32 %v963_v33, %v414_v15 }
  0xe7   : > { %v449_v18 = vmax.f32 %v415_v16, 0.0 }
  0xe9   : > { %526 = vmatmul.f32.gmra.mxu1 %v449_v18 }
  0xec   : > { %v417_v22 = vpop.f32.mrf.mxu0 }
  0xed   : > { %v418_v23 = vadd.f32 %v963_v33, %v417_v22 }
  0xef   : > { %v450_v25 = vmax.f32 %v418_v23, 0.0 }
  0xf1   : > { %529 = vmatmul.f32.gmra.mxu1 %v450_v25 }
  0xf4   : > { %v420_v28 = vpop.f32.mrf.mxu0 }
  0xf5   : > { %v421_v29 = vadd.f32 %v963_v33, %v420_v28 }
  0xf7   : > { %v451_v30 = vmax.f32 %v421_v29, 0.0 }
  0xf9   : > { %532 = vmatmul.f32.gmra.mxu1 %v451_v30 }
  0xfc   : > { %v423_v31 = vpop.f32.mrf.mxu0 }
  0xfd   : > { %v424_v32 = vadd.f32 %v963_v33, %v423_v31  ;;  %v1062_v31 = vld [vmem:[%s1140_s6] ss:$0 sm:$0xff] }
  0xff   : > { %v452_v34 = vmax.f32 %v424_v32, 0.0 }
 0x101   : > { %535 = vmatmul.f32.vlgmr.msra.gmra.mxu3 %v452_v34 }
 0x104   : > { %v426_v35 = vpop.f32.mrf.mxu0 }
 0x105   : > { %v427_v36 = vadd.f32 %v963_v33, %v426_v35 }
 0x107   : > { %v453_v37 = vmax.f32 %v427_v36, 0.0 }
 0x109   : > { %538 = vmatmul.f32.gmra.mxu3 %v453_v37 }
 0x10c   : > { %v429_v39 = vpop.f32.mrf.mxu0 }
 0x10d   : > { %v430_v40 = vadd.f32 %v963_v33, %v429_v39 }
 0x10e   : > { %v494_v41 = vpop.f32.mrf.mxu1 }
 0x10f   : > { %v454_v42 = vmax.f32 %v430_v40, 0.0  ;;  %v495_v43 = vadd.f32 %v1038_v38, %v494_v41 }
 0x111   : > { %v551_v44 = vmax.f32 %v495_v43, 0.0  ;;  %541 = vmatmul.f32.gmra.mxu3 %v454_v42 }
 0x113   : > { %606 = vmatmul.f32.vlgmr.msra.gmra.mxu2 %v551_v44 }
 0x114   : > { %v432_v45 = vpop.f32.mrf.mxu0 }
 0x115   : > { %v433_v46 = vadd.f32 %v963_v33, %v432_v45 }
 0x116   : > { %v497_v47 = vpop.f32.mrf.mxu1 }
 0x117   : > { %v455_v48 = vmax.f32 %v433_v46, 0.0  ;;  %v498_v49 = vadd.f32 %v1038_v38, %v497_v47 }
 0x119   : > { %v552_v50 = vmax.f32 %v498_v49, 0.0  ;;  %544 = vmatmul.f32.gmra.mxu3 %v455_v48 }
 0x11b   : > { %609 = vmatmul.f32.gmra.mxu2 %v552_v50 }
 0x11c   : > { %v435_v51 = vpop.f32.mrf.mxu0 }
 0x11d   : > { %v436_v52 = vadd.f32 %v963_v33, %v435_v51 }
 0x11e   : > { %v500_v53 = vpop.f32.mrf.mxu1 }
 0x11f   : > { %v456_v54 = vmax.f32 %v436_v52, 0.0  ;;  %v501_v55 = vadd.f32 %v1038_v38, %v500_v53 }
 0x121   : > { %v553_v56 = vmax.f32 %v501_v55, 0.0  ;;  %547 = vmatmul.f32.gmra.mxu3 %v456_v54 }
 0x123   : > { %612 = vmatmul.f32.gmra.mxu2 %v553_v56 }
 0x126   : > { %v503_v57 = vpop.f32.mrf.mxu1 }
 0x127   : > { %v504_v58 = vadd.f32 %v1038_v38, %v503_v57 }
 0x129   : > { %v554_v59 = vmax.f32 %v504_v58, 0.0 }
 0x12b   : > { %615 = vmatmul.f32.gmra.mxu2 %v554_v59 }
 0x12e   : > { %v506_v60 = vpop.f32.mrf.mxu1 }
 0x12f   : > { %v507_v61 = vadd.f32 %v1038_v38, %v506_v60 }
 0x131   : > { %v555_v62 = vmax.f32 %v507_v61, 0.0 }
 0x133   : > { %618 = vmatmul.f32.gmra.mxu2 %v555_v62 }
 0x136   : > { %v509_v63 = vpop.f32.mrf.mxu1 }
 0x137   : > { %v510_v33 = vadd.f32 %v1038_v38, %v509_v63 }
 0x139   : > { %v556_v0 = vmax.f32 %v510_v33, 0.0 }
 0x13b   : > { %621 = vmatmul.f32.gmra.mxu2 %v556_v0 }
 0x13e   : > { %v512_v1 = vpop.f32.mrf.mxu1 }
 0x13f   : > { %v513_v2 = vadd.f32 %v1038_v38, %v512_v1 }
 0x141   : > { %v557_v3 = vmax.f32 %v513_v2, 0.0 }
 0x143   : > { %624 = vmatmul.f32.gmra.mxu2 %v557_v3 }
 0x146   : > { %v515_v4 = vpop.f32.mrf.mxu1 }
 0x147   : > { %v516_v5 = vadd.f32 %v1038_v38, %v515_v4 }
 0x149   : > { %v558_v6 = vmax.f32 %v516_v5, 0.0 }
 0x14b   : > { %627 = vmatmul.f32.gmra.mxu2 %v558_v6 }
 0x14e   : > { %v518_v7 = vpop.f32.mrf.mxu1 }
 0x14f   : > { %v519_v8 = vadd.f32 %v1038_v38, %v518_v7 }
 0x151   : > { %v559_v9 = vmax.f32 %v519_v8, 0.0 }
 0x153   : > { %630 = vmatmul.f32.gmra.mxu2 %v559_v9 }
 0x156   : > { %v521_v10 = vpop.f32.mrf.mxu1 }
 0x157   : > { %v522_v11 = vadd.f32 %v1038_v38, %v521_v10 }
 0x159   : > { %v560_v12 = vmax.f32 %v522_v11, 0.0 }
 0x15b   : > { %633 = vmatmul.f32.gmra.mxu2 %v560_v12 }
 0x15e   : > { %v524_v13 = vpop.f32.mrf.mxu1 }
 0x15f   : > { %v525_v14 = vadd.f32 %v1038_v38, %v524_v13 }
 0x161   : > { %v561_v15 = vmax.f32 %v525_v14, 0.0 }
 0x163   : > { %636 = vmatmul.f32.gmra.mxu2 %v561_v15 }
 0x166   : > { %v527_v16 = vpop.f32.mrf.mxu1 }
 0x167   : > { %v528_v17 = vadd.f32 %v1038_v38, %v527_v16 }
 0x169   : > { %v562_v18 = vmax.f32 %v528_v17, 0.0 }
 0x16b   : > { %639 = vmatmul.f32.gmra.mxu2 %v562_v18 }
 0x16e   : > { %v530_v19 = vpop.f32.mrf.mxu1 }
 0x16f   : > { %v531_v20 = vadd.f32 %v1038_v38, %v530_v19 }
 0x171   : > { %v563_v21 = vmax.f32 %v531_v20, 0.0 }
 0x173   : > { %642 = vmatmul.f32.gmra.mxu2 %v563_v21 }
 0x176   : > { %v533_v22 = vpop.f32.mrf.mxu1 }
 0x177   : > { %v534_v23 = vadd.f32 %v1038_v38, %v533_v22 }
 0x179   : > { %v564_v24 = vmax.f32 %v534_v23, 0.0 }
 0x17b   : > { %645 = vmatmul.f32.gmra.mxu2 %v564_v24 }
 0x184   : > { %v536_v25 = vpop.f32.mrf.mxu3 }
 0x185   : > { %v537_v26 = vadd.f32 %v1038_v38, %v536_v25 }
 0x187   : > { %v565_v27 = vmax.f32 %v537_v26, 0.0 }
 0x189   : > { %648 = vmatmul.f32.vlgmr.msrb.gmra.mxu3 %v565_v27 }
 0x18c   : > { %v539_v28 = vpop.f32.mrf.mxu3 }
 0x18d   : > { %v540_v29 = vadd.f32 %v1038_v38, %v539_v28 }
 0x18f   : > { %v566_v30 = vmax.f32 %v540_v29, 0.0 }
 0x191   : > { %651 = vmatmul.f32.gmra.mxu3 %v566_v30 }
 0x194   : > { %v542_v32 = vpop.f32.mrf.mxu3 }
 0x195   : > { %v543_v34 = vadd.f32 %v1038_v38, %v542_v32 }
 0x196   : > { %v607_v35 = vpop.f32.mrf.mxu2 }
 0x197   : > { %v567_v36 = vmax.f32 %v543_v34, 0.0  ;;  %v608_v37 = vadd.f32 %v1062_v31, %v607_v35 }
 0x199   : > { %665 = vst.msk [vmem:[%s1070_s23] sm:$0xff] %vm664_vm1, %v608_v37  ;;  %654 = vmatmul.f32.gmra.mxu3 %v567_v36 }
 0x19c   : > { %v545_v39 = vpop.f32.mrf.mxu3 }
 0x19d   : > { %v546_v40 = vadd.f32 %v1038_v38, %v545_v39 }
 0x19e   : > { %v610_v41 = vpop.f32.mrf.mxu2 }
 0x19f   : > { %v568_v42 = vmax.f32 %v546_v40, 0.0  ;;  %v611_v43 = vadd.f32 %v1062_v31, %v610_v41 }
 0x1a1   : > { %666 = vst.msk [vmem:[%s1070_s23 + $0x8] sm:$0xff] %vm664_vm1, %v611_v43  ;;  %657 = vmatmul.f32.gmra.mxu3 %v568_v42 }
 0x1a4   : > { %v548_v44 = vpop.f32.mrf.mxu3 }
 0x1a5   : > { %v549_v45 = vadd.f32 %v1038_v38, %v548_v44 }
 0x1a6   : > { %v613_v46 = vpop.f32.mrf.mxu2 }
 0x1a7   : > { %v569_v47 = vmax.f32 %v549_v45, 0.0  ;;  %v614_v48 = vadd.f32 %v1062_v31, %v613_v46 }
 0x1a9   : > { %667 = vst.msk [vmem:[%s1070_s23 + $0x10] sm:$0xff] %vm664_vm1, %v614_v48  ;;  %660 = vmatmul.f32.gmra.mxu3 %v569_v47 }
 0x1ae   : > { %v616_v49 = vpop.f32.mrf.mxu2 }
 0x1af   : > { %v617_v50 = vadd.f32 %v1062_v31, %v616_v49 }
 0x1b1   : > { %668 = vst.msk [vmem:[%s1070_s23 + $0x18] sm:$0xff] %vm664_vm1, %v617_v50 }
 0x1b6   : > { %v619_v51 = vpop.f32.mrf.mxu2 }
 0x1b7   : > { %v620_v52 = vadd.f32 %v1062_v31, %v619_v51 }
 0x1b9   : > { %669 = vst.msk [vmem:[%s1070_s23 + $0x20] sm:$0xff] %vm664_vm1, %v620_v52 }
 0x1be   : > { %v622_v38 = vpop.f32.mrf.mxu2 }
 0x1bf   : > { %v623_v53 = vadd.f32 %v1062_v31, %v622_v38 }
 0x1c1   : > { %670 = vst.msk [vmem:[%s1070_s23 + $0x28] sm:$0xff] %vm664_vm1, %v623_v53 }
 0x1c6   : > { %v625_v54 = vpop.f32.mrf.mxu2 }
 0x1c7   : > { %v626_v55 = vadd.f32 %v1062_v31, %v625_v54 }
 0x1c9   : > { %671 = vst.msk [vmem:[%s1070_s23 + $0x30] sm:$0xff] %vm664_vm1, %v626_v55 }
 0x1ce   : > { %v628_v56 = vpop.f32.mrf.mxu2 }
 0x1cf   : > { %v629_v57 = vadd.f32 %v1062_v31, %v628_v56 }
 0x1d1   : > { %672 = vst.msk [vmem:[%s1070_s23 + $0x38] sm:$0xff] %vm664_vm1, %v629_v57 }
 0x1d6   : > { %v631_v58 = vpop.f32.mrf.mxu2 }
 0x1d7   : > { %v632_v59 = vadd.f32 %v1062_v31, %v631_v58 }
 0x1d9   : > { %673 = vst.msk [vmem:[%s1070_s23 + $0x40] sm:$0xff] %vm664_vm1, %v632_v59 }
 0x1de   : > { %v634_v60 = vpop.f32.mrf.mxu2 }
 0x1df   : > { %v635_v61 = vadd.f32 %v1062_v31, %v634_v60 }
 0x1e1   : > { %674 = vst.msk [vmem:[%s1070_s23 + $0x48] sm:$0xff] %vm664_vm1, %v635_v61 }
 0x1e6   : > { %v637_v62 = vpop.f32.mrf.mxu2 }
 0x1e7   : > { %v638_v63 = vadd.f32 %v1062_v31, %v637_v62 }
 0x1e9   : > { %675 = vst.msk [vmem:[%s1070_s23 + $0x50] sm:$0xff] %vm664_vm1, %v638_v63 }
 0x1ee   : > { %v640_v33 = vpop.f32.mrf.mxu2 }
 0x1ef   : > { %v641_v0 = vadd.f32 %v1062_v31, %v640_v33 }
 0x1f1   : > { %676 = vst.msk [vmem:[%s1070_s23 + $0x58] sm:$0xff] %vm664_vm1, %v641_v0 }
 0x1f6   : > { %v643_v1 = vpop.f32.mrf.mxu2 }
 0x1f7   : > { %v644_v2 = vadd.f32 %v1062_v31, %v643_v1 }
 0x1f9   : > { %677 = vst.msk [vmem:[%s1070_s23 + $0x60] sm:$0xff] %vm664_vm1, %v644_v2 }
 0x1fe   : > { %v646_v3 = vpop.f32.mrf.mxu2 }
 0x1ff   : > { %v647_v4 = vadd.f32 %v1062_v31, %v646_v3 }
 0x201   : > { %678 = vst.msk [vmem:[%s1070_s23 + $0x68] sm:$0xff] %vm664_vm1, %v647_v4 }
 0x20c   : > { %v649_v5 = vpop.f32.mrf.mxu3 }
 0x20d   : > { %v650_v6 = vadd.f32 %v1062_v31, %v649_v5 }
 0x20f   : > { %679 = vst.msk [vmem:[%s1070_s23 + $0x70] sm:$0xff] %vm664_vm1, %v650_v6 }
 0x214   : > { %v652_v7 = vpop.f32.mrf.mxu3 }
 0x215   : > { %v653_v8 = vadd.f32 %v1062_v31, %v652_v7 }
 0x217   : > { %680 = vst.msk [vmem:[%s1070_s23 + $0x78] sm:$0xff] %vm664_vm1, %v653_v8 }
 0x21c   : > { %v655_v9 = vpop.f32.mrf.mxu3 }
 0x21d   : > { %v656_v10 = vadd.f32 %v1062_v31, %v655_v9 }
 0x21f   : > { %681 = vst.msk [vmem:[%s1070_s23 + $0x80] sm:$0xff] %vm664_vm1, %v656_v10 }
 0x224   : > { %v658_v11 = vpop.f32.mrf.mxu3 }
 0x225   : > { %v659_v12 = vadd.f32 %v1062_v31, %v658_v11 }
 0x227   : > { %682 = vst.msk [vmem:[%s1070_s23 + $0x88] sm:$0xff] %vm664_vm1, %v659_v12 }
 0x22c   : > { %v661_v13 = vpop.f32.mrf.mxu3 }
 0x22d   : > { %v662_v14 = vadd.f32 %v1062_v31, %v661_v13 }
 0x22f   : > { %683 = vst.msk [vmem:[%s1070_s23 + $0x90] sm:$0xff] %vm664_vm1, %v662_v14 }
 0x230 PF: > { %s17_s24 = sadd.s32 1, %s817_s24  }
 0x231   : > { %p14_p4 = scmp.ge.s32.totalorder %s17_s24, 4  }
 0x233   :  { %16 = sbr.rel (!%p14_p4) target bundleno = 1 (0x1), region = 78 }

</bundles_post_ra>
